<compile_context>
chip_gen: v7x
topology: tpu7x:2x2x1
jax: 0.10.0
libtpu: 0.0.40
codegen_flags: <defaults>
</compile_context>

<pallas_src>
import jax
import jax.numpy as jnp
from jax.experimental import pallas as pl
from jax.experimental.pallas import tpu as pltpu


def _double_conv_kernel(x_ref, t1_ref, b1_ref, t2_ref, b2_ref, o_ref):
    """One grid step = B images.

    x_ref : (B, H+2, W*Cin)      H-padded channel-minor rows (halo added wrapper-side)
    t1_ref: (3*W*Cin,  W*Cmid)   ky-stacked block-Toeplitz weights, BN1 scale folded, bf16
    b1_ref: (1, W*Cmid)          folded BN1 bias tiled across W, f32
    t2_ref: (3*W*Cmid, W*Cout)   ky-stacked block-Toeplitz weights, BN2 scale folded, bf16
    b2_ref: (1, W*Cout)          folded BN2 bias tiled across W, f32
    o_ref : (B, H, W*Cout)       lane-dense output
    """
    B, hp, wc_in = x_ref.shape
    H = hp - 2
    wc_mid = t1_ref.shape[-1]
    wc_out = t2_ref.shape[-1]

    # ---- conv1: one matmul, K = 3*W*Cin (ky taps fused along K) ----
    x = x_ref[...].astype(t1_ref.dtype)                              # bf16 MXU operand
    lhs1 = jnp.concatenate([x[:, 0:H], x[:, 1:H + 1], x[:, 2:H + 2]],
                           axis=-1).reshape(B * H, 3 * wc_in)
    acc1 = jnp.dot(lhs1, t1_ref[...], preferred_element_type=jnp.float32)
    mid = jnp.maximum(acc1 + b1_ref[...], 0.0)                       # BN1 bias + ReLU in f32
    mid = mid.reshape(B, H, wc_mid).astype(t2_ref.dtype)             # bf16 MXU operand

    # ---- conv2: one matmul, K = 3*W*Cmid ----
    zrow = jnp.zeros((B, 1, wc_mid), mid.dtype)
    midp = jnp.concatenate([zrow, mid, zrow], axis=1)                # per-image 1-row H halo
    lhs2 = jnp.concatenate([midp[:, 0:H], midp[:, 1:H + 1], midp[:, 2:H + 2]],
                           axis=-1).reshape(B * H, 3 * wc_mid)
    acc2 = jnp.dot(lhs2, t2_ref[...], preferred_element_type=jnp.float32)
    out = jnp.maximum(acc2 + b2_ref[...], 0.0)                       # BN2 bias + ReLU in f32
    o_ref[...] = out.reshape(B, H, wc_out).astype(o_ref.dtype)


def _toeplitz_weights(w_hwio, width):
    """(3, 3, Ci, Co) -> (3*width*Ci, width*Co): ky taps stacked along the contraction dim.

    Block (w_in, w_out) of tap ky is w[ky, kx] with kx = w_in - w_out + 1; taps that fall on the
    zero 'same' padding along W are dropped (equivalent to zero padding).
    """
    per_ky = [
        sum(jnp.kron(jnp.eye(width, k=1 - kx, dtype=w_hwio.dtype), w_hwio[ky, kx])
            for kx in range(3))
        for ky in range(3)
    ]
    return jnp.concatenate(per_ky, axis=0)


def _pick_images_per_block(n, h, target_rows=256, min_rows=64):
    """Images per grid step: fill the MXU M dimension (~128-256 rows) while keeping >=2 parallel
    grid steps for v7x's two TensorCores whenever that still gives a usable M."""
    divisors = [b for b in range(1, n + 1) if n % b == 0]
    good = [b for b in divisors if min_rows <= b * h <= target_rows and n // b >= 2]
    if good:
        return max(good)
    fits = [b for b in divisors if b * h <= target_rows]
    return max(fits) if fits else 1


def double_conv(x_nchw, params, eps=1e-5):
    """params: PyTorch-layout weights/BN running stats. Input/output NCHW (matches nn.Conv2d)."""
    N, Cin, H, W = x_nchw.shape
    dtype = x_nchw.dtype
    # bf16 MXU operands for f32 models (2-4x MXU rate on v6e/v7x); accumulation stays f32.
    mxu_dtype = jnp.bfloat16 if dtype == jnp.float32 else dtype

    # Fold eval-mode BN into per-output-channel scale/bias (f32 math).
    s1 = params["g1"] / jnp.sqrt(params["v1"] + eps)
    b1 = params["be1"] - params["m1"] * s1
    s2 = params["g2"] / jnp.sqrt(params["v2"] + eps)
    b2 = params["be2"] - params["m2"] * s2

    # PyTorch OIHW -> HWIO, fold BN scale into the weights (conv is linear in the weights).
    w1s = jnp.transpose(params["w1"], (2, 3, 1, 0)) * s1
    w2s = jnp.transpose(params["w2"], (2, 3, 1, 0)) * s2
    Cmid, Cout = w1s.shape[-1], w2s.shape[-1]

    # ky-stacked block-Toeplitz weights (kx taps + zero W-padding + BN scale folded in), bf16.
    t1 = _toeplitz_weights(w1s, W).astype(mxu_dtype)      # (3*W*Cin,  W*Cmid)
    t2 = _toeplitz_weights(w2s, W).astype(mxu_dtype)      # (3*W*Cmid, W*Cout)
    b1t = jnp.tile(b1, W)[None, :].astype(jnp.float32)    # (1, W*Cmid)
    b2t = jnp.tile(b2, W)[None, :].astype(jnp.float32)    # (1, W*Cout)

    # NCHW -> channel-minor rows; the conv1 'same' halo along H is padded once here so the block
    # DMA delivers (H+2) rows and the kernel never re-pads. The W halo lives in the Toeplitz weights.
    x_rows = jnp.transpose(x_nchw, (0, 2, 3, 1)).reshape(N, H, W * Cin)
    x_rows = jnp.pad(x_rows, ((0, 0), (1, 1), (0, 0)))    # (N, H+2, W*Cin)

    B = _pick_images_per_block(N, H)
    grid = (N // B,)
    compiler_params = pltpu.CompilerParams(
        dimension_semantics=("parallel",),
        # Default scoped VMEM (16/32 MiB) is far below physical; raise it so larger blocks fit.
        vmem_limit_bytes=64 * 1024 * 1024,
    )

    def _run(single_buffer_weights):
        # Constant-index weights/biases don't need double buffering -> halve their VMEM residency.
        wkw = dict(pipeline_mode=pl.Buffered(1)) if single_buffer_weights else {}
        in_specs = [
            pl.BlockSpec((B, H + 2, W * Cin), lambda n: (n, 0, 0)),
            pl.BlockSpec((3 * W * Cin, W * Cmid), lambda n: (0, 0), **wkw),
            pl.BlockSpec((1, W * Cmid), lambda n: (0, 0), **wkw),
            pl.BlockSpec((3 * W * Cmid, W * Cout), lambda n: (0, 0), **wkw),
            pl.BlockSpec((1, W * Cout), lambda n: (0, 0), **wkw),
        ]
        out_specs = pl.BlockSpec((B, H, W * Cout), lambda n: (n, 0, 0))
        out_rows = pl.pallas_call(
            _double_conv_kernel,
            out_shape=jax.ShapeDtypeStruct((N, H, W * Cout), dtype),
            grid=grid,
            in_specs=in_specs,
            out_specs=out_specs,
            compiler_params=compiler_params,
        )(x_rows, t1, b1t, t2, b2t)
        return jax.block_until_ready(out_rows)

    try:
        out_rows = _run(True)
    except Exception:
        # This jax version rejects pl.Buffered(1) single-buffering; the default double-buffered
        # specs are functionally identical (just use a bit more VMEM for the constant weights).
        out_rows = _run(False)

    # (N, H, W*Cout) -> NCHW
    return jnp.transpose(out_rows.reshape(N, H, W, Cout), (0, 3, 1, 2))


def _reference(x_nchw, params, eps=1e-5):
    """Pure-JAX reference of the same eval-mode DoubleConv forward (NCHW)."""
    def conv(x, w):  # x NCHW, w OIHW
        return jax.lax.conv_general_dilated(
            x, w, window_strides=(1, 1), padding=((1, 1), (1, 1)),
            dimension_numbers=("NCHW", "OIHW", "NCHW"))

    def bn(x, g, b, m, v):
        return (x - m[None, :, None, None]) / jnp.sqrt(v[None, :, None, None] + eps) \
            * g[None, :, None, None] + b[None, :, None, None]

    h = jnp.maximum(bn(conv(x_nchw, params["w1"]), params["g1"], params["be1"],
                       params["m1"], params["v1"]), 0.0)
    return jnp.maximum(bn(conv(h, params["w2"]), params["g2"], params["be2"],
                          params["m2"], params["v2"]), 0.0)


def _init_params(key, in_channels, mid_channels, out_channels):
    ks = jax.random.split(key, 10)
    return {
        "w1": 0.1 * jax.random.normal(ks[0], (mid_channels, in_channels, 3, 3), jnp.float32),
        "g1": 1.0 + 0.1 * jax.random.normal(ks[1], (mid_channels,), jnp.float32),
        "be1": 0.1 * jax.random.normal(ks[2], (mid_channels,), jnp.float32),
        "m1": 0.1 * jax.random.normal(ks[3], (mid_channels,), jnp.float32),
        "v1": 1.0 + 0.1 * jnp.abs(jax.random.normal(ks[4], (mid_channels,), jnp.float32)),
        "w2": 0.1 * jax.random.normal(ks[5], (out_channels, mid_channels, 3, 3), jnp.float32),
        "g2": 1.0 + 0.1 * jax.random.normal(ks[6], (out_channels,), jnp.float32),
        "be2": 0.1 * jax.random.normal(ks[7], (out_channels,), jnp.float32),
        "m2": 0.1 * jax.random.normal(ks[8], (out_channels,), jnp.float32),
        "v2": 1.0 + 0.1 * jnp.abs(jax.random.normal(ks[9], (out_channels,), jnp.float32)),
    }


if __name__ == "__main__":
    key = jax.random.PRNGKey(0)
    k_x, k_p = jax.random.split(key)

    N, Cin, H, W = 2, 4, 16, 16
    Cmid = Cout = 8   # mid_channels defaults to out_channels in the PyTorch module

    x = jax.random.normal(k_x, (N, Cin, H, W), jnp.float32)
    params = _init_params(k_p, Cin, Cmid, Cout)

    out = jax.block_until_ready(double_conv(x, params))
    ref = jax.block_until_ready(_reference(x, params))

    assert out.shape == (N, Cout, H, W), out.shape
    # bf16 MXU operands (f32 accumulation) vs f32 reference: 5e-2 tolerance is ample at this scale.
    if not jnp.allclose(out, ref, atol=5e-2, rtol=5e-2):
        raise AssertionError("Pallas DoubleConv does not match reference")

    print("KERNEL_OK")
</pallas_src>

<mosaic_0001>
module attributes {stable_mosaic.version = 11 : i64} {
  func.func @_double_conv_kernel(%arg0: i32, %arg1: memref<2x18x64xf32, #tpu.memory_space<vmem>>, %arg2: memref<192x128xbf16, #tpu.memory_space<vmem>>, %arg3: memref<1x128xf32, #tpu.memory_space<vmem>>, %arg4: memref<384x128xbf16, #tpu.memory_space<vmem>>, %arg5: memref<1x128xf32, #tpu.memory_space<vmem>>, %arg6: memref<2x16x128xf32, #tpu.memory_space<vmem>>) attributes {dimension_semantics = [#tpu.dimension_semantics<parallel>], iteration_bounds = array<i64: 1>, scalar_prefetch = 0 : i64, scratch_operands = 0 : i64, tpu.core_type = #tpu.core_type<tc>, window_params = [{transform_indices = @transform_0, window_bounds = array<i64: 2, 18, 64>}, {pipeline_mode = #tpu.pipeline_mode<synchronous>, transform_indices = @transform_1, window_bounds = array<i64: 192, 128>}, {pipeline_mode = #tpu.pipeline_mode<synchronous>, transform_indices = @transform_2, window_bounds = array<i64: 1, 128>}, {pipeline_mode = #tpu.pipeline_mode<synchronous>, transform_indices = @transform_3, window_bounds = array<i64: 384, 128>}, {pipeline_mode = #tpu.pipeline_mode<synchronous>, transform_indices = @transform_4, window_bounds = array<i64: 1, 128>}, {transform_indices = @transform_5, window_bounds = array<i64: 2, 16, 128>}]} {
    %c0 = arith.constant 0 : index
    %c0_0 = arith.constant 0 : index
    %c0_1 = arith.constant 0 : index
    %0 = vector.load %arg1[%c0, %c0_0, %c0_1] : memref<2x18x64xf32, #tpu.memory_space<vmem>>, vector<2x18x64xf32>
    %1 = arith.truncf %0 : vector<2x18x64xf32> to vector<2x18x64xbf16>
    %2 = vector.extract_strided_slice %1 {offsets = [0, 0, 0], sizes = [2, 16, 64], strides = [1, 1, 1]} : vector<2x18x64xbf16> to vector<2x16x64xbf16>
    %3 = vector.extract_strided_slice %1 {offsets = [0, 1, 0], sizes = [2, 16, 64], strides = [1, 1, 1]} : vector<2x18x64xbf16> to vector<2x16x64xbf16>
    %4 = vector.extract_strided_slice %1 {offsets = [0, 2, 0], sizes = [2, 16, 64], strides = [1, 1, 1]} : vector<2x18x64xbf16> to vector<2x16x64xbf16>
    %5 = tpu.concatenate %2, %3, %4 in 2 : vector<2x16x64xbf16>, vector<2x16x64xbf16>, vector<2x16x64xbf16> -> vector<2x16x192xbf16>
    %6 = vector.shape_cast %5 : vector<2x16x192xbf16> to vector<32x192xbf16>
    %c0_2 = arith.constant 0 : index
    %c0_3 = arith.constant 0 : index
    %7 = vector.load %arg2[%c0_2, %c0_3] : memref<192x128xbf16, #tpu.memory_space<vmem>>, vector<192x128xbf16>
    %cst = arith.constant dense<0.000000e+00> : vector<32x128xf32>
    %8 = tpu.matmul %6, %7, %cst {dimension_numbers = #tpu.dot_dimension_numbers<[1], [0], [0], [1], [0, 0, 1, 1], [], []>} : vector<32x192xbf16>, vector<192x128xbf16>, vector<32x128xf32> -> vector<32x128xf32>
    %c0_4 = arith.constant 0 : index
    %c0_5 = arith.constant 0 : index
    %9 = vector.load %arg3[%c0_4, %c0_5] : memref<1x128xf32, #tpu.memory_space<vmem>>, vector<1x128xf32>
    %10 = vector.broadcast %9 : vector<1x128xf32> to vector<32x128xf32>
    %11 = arith.addf %8, %10 : vector<32x128xf32>
    %cst_6 = arith.constant 0.000000e+00 : f32
    %12 = vector.broadcast %cst_6 : f32 to vector<32x128xf32>
    %13 = arith.maximumf %11, %12 : vector<32x128xf32>
    %14 = vector.shape_cast %13 : vector<32x128xf32> to vector<2x16x128xf32>
    %15 = arith.truncf %14 : vector<2x16x128xf32> to vector<2x16x128xbf16>
    %cst_7 = arith.constant 0.000000e+00 : bf16
    %16 = vector.broadcast %cst_7 : bf16 to vector<2x1x128xbf16>
    %17 = tpu.concatenate %16, %15, %16 in 1 : vector<2x1x128xbf16>, vector<2x16x128xbf16>, vector<2x1x128xbf16> -> vector<2x18x128xbf16>
    %18 = vector.extract_strided_slice %17 {offsets = [0, 0, 0], sizes = [2, 16, 128], strides = [1, 1, 1]} : vector<2x18x128xbf16> to vector<2x16x128xbf16>
    %19 = vector.extract_strided_slice %17 {offsets = [0, 1, 0], sizes = [2, 16, 128], strides = [1, 1, 1]} : vector<2x18x128xbf16> to vector<2x16x128xbf16>
    %20 = vector.extract_strided_slice %17 {offsets = [0, 2, 0], sizes = [2, 16, 128], strides = [1, 1, 1]} : vector<2x18x128xbf16> to vector<2x16x128xbf16>
    %21 = tpu.concatenate %18, %19, %20 in 2 : vector<2x16x128xbf16>, vector<2x16x128xbf16>, vector<2x16x128xbf16> -> vector<2x16x384xbf16>
    %22 = vector.shape_cast %21 : vector<2x16x384xbf16> to vector<32x384xbf16>
    %c0_8 = arith.constant 0 : index
    %c0_9 = arith.constant 0 : index
    %23 = vector.load %arg4[%c0_8, %c0_9] : memref<384x128xbf16, #tpu.memory_space<vmem>>, vector<384x128xbf16>
    %cst_10 = arith.constant dense<0.000000e+00> : vector<32x128xf32>
    %24 = tpu.matmul %22, %23, %cst_10 {dimension_numbers = #tpu.dot_dimension_numbers<[1], [0], [0], [1], [0, 0, 1, 1], [], []>} : vector<32x384xbf16>, vector<384x128xbf16>, vector<32x128xf32> -> vector<32x128xf32>
    %c0_11 = arith.constant 0 : index
    %c0_12 = arith.constant 0 : index
    %25 = vector.load %arg5[%c0_11, %c0_12] : memref<1x128xf32, #tpu.memory_space<vmem>>, vector<1x128xf32>
    %26 = vector.broadcast %25 : vector<1x128xf32> to vector<32x128xf32>
    %27 = arith.addf %24, %26 : vector<32x128xf32>
    %cst_13 = arith.constant 0.000000e+00 : f32
    %28 = vector.broadcast %cst_13 : f32 to vector<32x128xf32>
    %29 = arith.maximumf %27, %28 : vector<32x128xf32>
    %30 = vector.shape_cast %29 : vector<32x128xf32> to vector<2x16x128xf32>
    %c0_14 = arith.constant 0 : index
    %c0_15 = arith.constant 0 : index
    %c0_16 = arith.constant 0 : index
    %31 = vector.load %arg6[%c0_14, %c0_15, %c0_16] : memref<2x16x128xf32, #tpu.memory_space<vmem>>, vector<2x16x128xf32>
    tpu.vector_store %arg6[%c0_14, %c0_15, %c0_16], %30 {strides = array<i32>} : memref<2x16x128xf32, #tpu.memory_space<vmem>>, vector<2x16x128xf32>,
    return
  }
  func.func @transform_0(%arg0: i32) -> (i32, i32, i32) {
    %c0_i32 = arith.constant 0 : i32
    %c0_i32_0 = arith.constant 0 : i32
    %c0_i32_1 = arith.constant 0 : i32
    return %arg0, %c0_i32, %c0_i32_0 : i32, i32, i32
  }
  func.func @transform_1(%arg0: i32) -> (i32, i32) {
    %c0_i32 = arith.constant 0 : i32
    %c0_i32_0 = arith.constant 0 : i32
    %c0_i32_1 = arith.constant 0 : i32
    return %c0_i32, %c0_i32_0 : i32, i32
  }
  func.func @transform_2(%arg0: i32) -> (i32, i32) {
    %c0_i32 = arith.constant 0 : i32
    %c0_i32_0 = arith.constant 0 : i32
    %c0_i32_1 = arith.constant 0 : i32
    return %c0_i32, %c0_i32_0 : i32, i32
  }
  func.func @transform_3(%arg0: i32) -> (i32, i32) {
    %c0_i32 = arith.constant 0 : i32
    %c0_i32_0 = arith.constant 0 : i32
    %c0_i32_1 = arith.constant 0 : i32
    return %c0_i32, %c0_i32_0 : i32, i32
  }
  func.func @transform_4(%arg0: i32) -> (i32, i32) {
    %c0_i32 = arith.constant 0 : i32
    %c0_i32_0 = arith.constant 0 : i32
    %c0_i32_1 = arith.constant 0 : i32
    return %c0_i32, %c0_i32_0 : i32, i32
  }
  func.func @transform_5(%arg0: i32) -> (i32, i32, i32) {
    %c0_i32 = arith.constant 0 : i32
    %c0_i32_0 = arith.constant 0 : i32
    %c0_i32_1 = arith.constant 0 : i32
    return %arg0, %c0_i32, %c0_i32_0 : i32, i32, i32
  }
}

module attributes {stable_mosaic.version = 11 : i64} {
  func.func @_double_conv_kernel(%arg0: i32, %arg1: memref<2x18x64xf32, #tpu.memory_space<vmem>>, %arg2: memref<192x128xbf16, #tpu.memory_space<vmem>>, %arg3: memref<1x128xf32, #tpu.memory_space<vmem>>, %arg4: memref<384x128xbf16, #tpu.memory_space<vmem>>, %arg5: memref<1x128xf32, #tpu.memory_space<vmem>>, %arg6: memref<2x16x128xf32, #tpu.memory_space<vmem>>) attributes {dimension_semantics = [#tpu.dimension_semantics<parallel>], iteration_bounds = array<i64: 1>, scalar_prefetch = 0 : i64, scratch_operands = 0 : i64, tpu.core_type = #tpu.core_type<tc>, window_params = [{transform_indices = @transform_0, window_bounds = array<i64: 2, 18, 64>}, {pipeline_mode = #tpu.pipeline_mode<synchronous>, transform_indices = @transform_1, window_bounds = array<i64: 192, 128>}, {pipeline_mode = #tpu.pipeline_mode<synchronous>, transform_indices = @transform_2, window_bounds = array<i64: 1, 128>}, {pipeline_mode = #tpu.pipeline_mode<synchronous>, transform_indices = @transform_3, window_bounds = array<i64: 384, 128>}, {pipeline_mode = #tpu.pipeline_mode<synchronous>, transform_indices = @transform_4, window_bounds = array<i64: 1, 128>}, {transform_indices = @transform_5, window_bounds = array<i64: 2, 16, 128>}]} {
    %c0 = arith.constant 0 : index
    %c0_0 = arith.constant 0 : index
    %c0_1 = arith.constant 0 : index
    %0 = vector.load %arg1[%c0, %c0_0, %c0_1] : memref<2x18x64xf32, #tpu.memory_space<vmem>>, vector<2x18x64xf32>
    %1 = arith.truncf %0 : vector<2x18x64xf32> to vector<2x18x64xbf16>
    %2 = vector.extract_strided_slice %1 {offsets = [0, 0, 0], sizes = [2, 16, 64], strides = [1, 1, 1]} : vector<2x18x64xbf16> to vector<2x16x64xbf16>
    %3 = vector.extract_strided_slice %1 {offsets = [0, 1, 0], sizes = [2, 16, 64], strides = [1, 1, 1]} : vector<2x18x64xbf16> to vector<2x16x64xbf16>
    %4 = vector.extract_strided_slice %1 {offsets = [0, 2, 0], sizes = [2, 16, 64], strides = [1, 1, 1]} : vector<2x18x64xbf16> to vector<2x16x64xbf16>
    %5 = tpu.concatenate %2, %3, %4 in 2 : vector<2x16x64xbf16>, vector<2x16x64xbf16>, vector<2x16x64xbf16> -> vector<2x16x192xbf16>
    %6 = vector.shape_cast %5 : vector<2x16x192xbf16> to vector<32x192xbf16>
    %c0_2 = arith.constant 0 : index
    %c0_3 = arith.constant 0 : index
    %7 = vector.load %arg2[%c0_2, %c0_3] : memref<192x128xbf16, #tpu.memory_space<vmem>>, vector<192x128xbf16>
    %cst = arith.constant dense<0.000000e+00> : vector<32x128xf32>
    %8 = tpu.matmul %6, %7, %cst {dimension_numbers = #tpu.dot_dimension_numbers<[1], [0], [0], [1], [0, 0, 1, 1], [], []>} : vector<32x192xbf16>, vector<192x128xbf16>, vector<32x128xf32> -> vector<32x128xf32>
    %c0_4 = arith.constant 0 : index
    %c0_5 = arith.constant 0 : index
    %9 = vector.load %arg3[%c0_4, %c0_5] : memref<1x128xf32, #tpu.memory_space<vmem>>, vector<1x128xf32>
    %10 = vector.broadcast %9 : vector<1x128xf32> to vector<32x128xf32>
    %11 = arith.addf %8, %10 : vector<32x128xf32>
    %cst_6 = arith.constant 0.000000e+00 : f32
    %12 = vector.broadcast %cst_6 : f32 to vector<32x128xf32>
    %13 = arith.maximumf %11, %12 : vector<32x128xf32>
    %14 = vector.shape_cast %13 : vector<32x128xf32> to vector<2x16x128xf32>
    %15 = arith.truncf %14 : vector<2x16x128xf32> to vector<2x16x128xbf16>
    %cst_7 = arith.constant 0.000000e+00 : bf16
    %16 = vector.broadcast %cst_7 : bf16 to vector<2x1x128xbf16>
    %17 = tpu.concatenate %16, %15, %16 in 1 : vector<2x1x128xbf16>, vector<2x16x128xbf16>, vector<2x1x128xbf16> -> vector<2x18x128xbf16>
    %18 = vector.extract_strided_slice %17 {offsets = [0, 0, 0], sizes = [2, 16, 128], strides = [1, 1, 1]} : vector<2x18x128xbf16> to vector<2x16x128xbf16>
    %19 = vector.extract_strided_slice %17 {offsets = [0, 1, 0], sizes = [2, 16, 128], strides = [1, 1, 1]} : vector<2x18x128xbf16> to vector<2x16x128xbf16>
    %20 = vector.extract_strided_slice %17 {offsets = [0, 2, 0], sizes = [2, 16, 128], strides = [1, 1, 1]} : vector<2x18x128xbf16> to vector<2x16x128xbf16>
    %21 = tpu.concatenate %18, %19, %20 in 2 : vector<2x16x128xbf16>, vector<2x16x128xbf16>, vector<2x16x128xbf16> -> vector<2x16x384xbf16>
    %22 = vector.shape_cast %21 : vector<2x16x384xbf16> to vector<32x384xbf16>
    %c0_8 = arith.constant 0 : index
    %c0_9 = arith.constant 0 : index
    %23 = vector.load %arg4[%c0_8, %c0_9] : memref<384x128xbf16, #tpu.memory_space<vmem>>, vector<384x128xbf16>
    %cst_10 = arith.constant dense<0.000000e+00> : vector<32x128xf32>
    %24 = tpu.matmul %22, %23, %cst_10 {dimension_numbers = #tpu.dot_dimension_numbers<[1], [0], [0], [1], [0, 0, 1, 1], [], []>} : vector<32x384xbf16>, vector<384x128xbf16>, vector<32x128xf32> -> vector<32x128xf32>
    %c0_11 = arith.constant 0 : index
    %c0_12 = arith.constant 0 : index
    %25 = vector.load %arg5[%c0_11, %c0_12] : memref<1x128xf32, #tpu.memory_space<vmem>>, vector<1x128xf32>
    %26 = vector.broadcast %25 : vector<1x128xf32> to vector<32x128xf32>
    %27 = arith.addf %24, %26 : vector<32x128xf32>
    %cst_13 = arith.constant 0.000000e+00 : f32
    %28 = vector.broadcast %cst_13 : f32 to vector<32x128xf32>
    %29 = arith.maximumf %27, %28 : vector<32x128xf32>
    %30 = vector.shape_cast %29 : vector<32x128xf32> to vector<2x16x128xf32>
    %c0_14 = arith.constant 0 : index
    %c0_15 = arith.constant 0 : index
    %c0_16 = arith.constant 0 : index
    %31 = vector.load %arg6[%c0_14, %c0_15, %c0_16] : memref<2x16x128xf32, #tpu.memory_space<vmem>>, vector<2x16x128xf32>
    tpu.vector_store %arg6[%c0_14, %c0_15, %c0_16], %30 {strides = array<i32>} : memref<2x16x128xf32, #tpu.memory_space<vmem>>, vector<2x16x128xf32>,
    return
  }
  func.func @transform_0(%arg0: i32) -> (i32, i32, i32) {
    %c0_i32 = arith.constant 0 : i32
    %c0_i32_0 = arith.constant 0 : i32
    %c0_i32_1 = arith.constant 0 : i32
    return %arg0, %c0_i32, %c0_i32_0 : i32, i32, i32
  }
  func.func @transform_1(%arg0: i32) -> (i32, i32) {
    %c0_i32 = arith.constant 0 : i32
    %c0_i32_0 = arith.constant 0 : i32
    %c0_i32_1 = arith.constant 0 : i32
    return %c0_i32, %c0_i32_0 : i32, i32
  }
  func.func @transform_2(%arg0: i32) -> (i32, i32) {
    %c0_i32 = arith.constant 0 : i32
    %c0_i32_0 = arith.constant 0 : i32
    %c0_i32_1 = arith.constant 0 : i32
    return %c0_i32, %c0_i32_0 : i32, i32
  }
  func.func @transform_3(%arg0: i32) -> (i32, i32) {
    %c0_i32 = arith.constant 0 : i32
    %c0_i32_0 = arith.constant 0 : i32
    %c0_i32_1 = arith.constant 0 : i32
    return %c0_i32, %c0_i32_0 : i32, i32
  }
  func.func @transform_4(%arg0: i32) -> (i32, i32) {
    %c0_i32 = arith.constant 0 : i32
    %c0_i32_0 = arith.constant 0 : i32
    %c0_i32_1 = arith.constant 0 : i32
    return %c0_i32, %c0_i32_0 : i32, i32
  }
  func.func @transform_5(%arg0: i32) -> (i32, i32, i32) {
    %c0_i32 = arith.constant 0 : i32
    %c0_i32_0 = arith.constant 0 : i32
    %c0_i32_1 = arith.constant 0 : i32
    return %arg0, %c0_i32, %c0_i32_0 : i32, i32, i32
  }
}

</mosaic_0001>

<bundles_post_ra>
// kernel: tpu_custom_call.1
= control target key start
LH: loop header
LB: loop body
LE: loop exit
PB: predicated region body
PF: predicated region fallthrough
CT: control target
= control target key end

     0   :  { %10 = vsyncpa [#allocation3], 0  ;;  %s1156_s0 = inlined_call_operand.hbm [shape: f32[2,18,64], index: 0, kind: input, shape index: {}]   ;;  %s1157_s1 = inlined_call_operand.hbm [shape: bf16[192,128], index: 1, kind: input, shape index: {}]   ;;  %s1158_s2 = inlined_call_operand.hbm [shape: f32[1,128], index: 2, kind: input, shape index: {}]   ;;  %s1159_s3 = inlined_call_operand.hbm [shape: bf16[384,128], index: 3, kind: input, shape index: {}]   ;;  %s1160_s4 = inlined_call_operand.hbm [shape: f32[1,128], index: 4, kind: input, shape index: {}]   ;;  %s1161_s5 = inlined_call_operand.hbm [shape: f32[2,16,128], index: 5, kind: output, shape index: {}]  }
   0x1   :  { %11 = vsyncpa [#allocation6], 0 }
   0x2   :  { %12 = vsyncpa [#allocation9], 0 }
   0x3   :  { %13 = vsyncpa [#allocation4], 0  ;;  %s979_s18 = smov [#allocation5]   ;;  %s839_s22 = scalar_lea.hbm %s1157_s1, 1536 }
   0x4   :  { %s31_s19 = sshll.u32 %s979_s18, 4  ;;  %p840_p0 = scmp.ne.s32.totalorder %s1157_s1, %s839_s22  ;;  %s32_s19 = int_to_ptr.vmem [resolvable:$true] %s31_s19 }
   0x5   :  { %p843_p1 = scmp.lt.u32.totalorder %s839_s22, %s1157_s1 }
   0x7   :  { %p845_p2 = pnand %p843_p1, %p840_p0 }
   0x9   :  { %848 = shalt.err (!%p845_p2)
}
   0xa   :  { %s849_s27 = scalar_lea.vmem %s32_s19, 1536  ;;  %p854_p4 = scmp.lt.s32.totalorder %s32_s19, %s32_s19 }
   0xb   :  { %p850_p3 = scmp.ne.s32.totalorder %s32_s19, %s849_s27  ;;  %p855_p5 = scmp.lt.s32.totalorder %s849_s27, %s849_s27 }
   0xd   :  { %p856_p6 = por %p855_p5, %p854_p4 }
   0xf   :  { %p857_p7 = pnand %p856_p6, %p850_p3 }
  0x11   :  { %860 = shalt.err (!%p857_p7)
}
  0x12   :  { %s980_s28 = smov 64   ;;  %s981_s29 = smov 4  }
  0x13   :  { %37 = dma.hbm_to_vmem [thread:$0]  %s1157_s1, 1536, %s32_s19, [#allocation6], %s980_s28, %s980_s28, %s981_s29  }
  0x14   :  { %s982_s7 = smov [#allocation8]   ;;  %s983_s9 = smov [#allocation2]  }
  0x15   :  { %s53_s8 = sshll.u32 %s982_s7, 4  ;;  %s19_s10 = sshll.u32 %s983_s9, 4  ;;  %s54_s8 = int_to_ptr.vmem [resolvable:$true] %s53_s8  ;;  %s20_s10 = int_to_ptr.vmem [resolvable:$true] %s19_s10 }
  0x16   :  { %s861_s13 = scalar_lea.hbm %s1159_s3, 3072 }
  0x17   :  { %p862_p8 = scmp.ne.s32.totalorder %s1159_s3, %s861_s13  ;;  %p865_p9 = scmp.lt.u32.totalorder %s861_s13, %s1159_s3 }
  0x19   :  { %p867_p10 = pnand %p865_p9, %p862_p8 }
  0x1b   :  { %870 = shalt.err (!%p867_p10)
}
  0x1c   :  { %s871_s1 = scalar_lea.vmem %s54_s8, 3072  ;;  %p876_p12 = scmp.lt.s32.totalorder %s54_s8, %s54_s8 }
  0x1d   :  { %p872_p11 = scmp.ne.s32.totalorder %s54_s8, %s871_s1  ;;  %p877_p13 = scmp.lt.s32.totalorder %s871_s1, %s871_s1 }
  0x1f   :  { %p878_p0 = por %p877_p13, %p876_p12 }
  0x21   :  { %p879_p1 = pnand %p878_p0, %p872_p11 }
  0x23   :  { %882 = shalt.err (!%p879_p1)
}
  0x24   :  { %59 = dma.hbm_to_vmem [thread:$0]  %s1159_s3, 3072, %s54_s8, [#allocation9], %s980_s28, %s980_s28, %s981_s29  }
  0x25   :  { %s883_s22 = scalar_lea.hbm %s1156_s0, 768 }
  0x26   :  { %p884_p2 = scmp.ne.s32.totalorder %s1156_s0, %s883_s22  ;;  %p887_p3 = scmp.lt.u32.totalorder %s883_s22, %s1156_s0 }
  0x28   :  { %p889_p4 = pnand %p887_p3, %p884_p2 }
  0x2a   :  { %892 = shalt.err (!%p889_p4)
}
  0x2b   :  { %s893_s27 = scalar_lea.vmem %s20_s10, 768  ;;  %p898_p6 = scmp.lt.s32.totalorder %s20_s10, %s20_s10 }
  0x2c   :  { %p894_p5 = scmp.ne.s32.totalorder %s20_s10, %s893_s27  ;;  %p899_p7 = scmp.lt.s32.totalorder %s893_s27, %s893_s27 }
  0x2e   :  { %p900_p8 = por %p899_p7, %p898_p6 }
  0x30   :  { %p901_p9 = pnand %p900_p8, %p894_p5 }
  0x32   :  { %904 = shalt.err (!%p901_p9)
}
  0x33   :  { %s984_s3 = smov 128   ;;  %s985_s29 = smov 8  }
  0x34   :  { %25 = dma.hbm_to_vmem [thread:$0]  %s1156_s0, 768, %s20_s10, [#allocation3], %s984_s3, %s984_s3, %s985_s29  }
  0x35   :  { %s986_s7 = smov [#allocation7]   ;;  %s987_s9 = smov [#allocation10]  }
  0x36   :  { %s44_s8 = sshll.u32 %s986_s7, 4  ;;  %s66_s11 = sshll.u32 %s987_s9, 4  ;;  %s45_s8 = int_to_ptr.vmem [resolvable:$true] %s44_s8  ;;  %s67_s11 = int_to_ptr.vmem [resolvable:$true] %s66_s11 }
  0x37   :  { %s905_s14 = scalar_lea.hbm %s1158_s2, 16 }
  0x38   :  { %p906_p10 = scmp.ne.s32.totalorder %s1158_s2, %s905_s14  ;;  %p909_p11 = scmp.lt.u32.totalorder %s905_s14, %s1158_s2 }
  0x3a   :  { %p911_p12 = pnand %p909_p11, %p906_p10 }
  0x3c   :  { %914 = shalt.err (!%p911_p12)
}
  0x3d   :  { %s915_s0 = scalar_lea.vmem %s45_s8, 16  ;;  %s919_s10 = scalar_lea.vmem %s45_s8, 32 }
  0x3e   :  { %p916_p13 = scmp.ne.s32.totalorder %s45_s8, %s915_s0  ;;  %p920_p0 = scmp.lt.s32.totalorder %s45_s8, %s45_s8 }
  0x3f   :  { %p921_p1 = scmp.lt.s32.totalorder %s919_s10, %s915_s0 }
  0x41   :  { %p922_p2 = por %p921_p1, %p920_p0 }
  0x43   :  { %p923_p3 = pnand %p922_p2, %p916_p13 }
  0x45   :  { %926 = shalt.err (!%p923_p3)
}
  0x46   :  { %47 = dma.hbm_to_vmem [thread:$0]  %s1158_s2, 16, %s45_s8, [#allocation6]  }
  0x47   :  { %s927_s22 = scalar_lea.hbm %s1160_s4, 16 }
  0x48   :  { %p928_p4 = scmp.ne.s32.totalorder %s1160_s4, %s927_s22  ;;  %p931_p5 = scmp.lt.u32.totalorder %s927_s22, %s1160_s4 }
  0x4a   :  { %p933_p6 = pnand %p931_p5, %p928_p4 }
  0x4c   :  { %936 = shalt.err (!%p933_p6)
}
  0x4d   :  { %s937_s27 = scalar_lea.vmem %s67_s11, 16  ;;  %s941_s30 = scalar_lea.vmem %s67_s11, 32 }
  0x4e   :  { %p938_p7 = scmp.ne.s32.totalorder %s67_s11, %s937_s27  ;;  %p942_p8 = scmp.lt.s32.totalorder %s67_s11, %s67_s11 }
  0x4f   :  { %p943_p9 = scmp.lt.s32.totalorder %s941_s30, %s937_s27 }
  0x51   :  { %p944_p10 = por %p943_p9, %p942_p8 }
  0x53   :  { %p945_p11 = pnand %p944_p10, %p938_p7 }
  0x55   :  { %948 = shalt.err (!%p945_p11)
}
  0x56   :  { %69 = dma.hbm_to_vmem [thread:$0]  %s1160_s4, 16, %s67_s11, [#allocation9]  }
  0x57   :  { %971 = dma.done.wait [#allocation3], 768  }
  0x58   :  { %972 = vsyncadd [#allocation3], 4294966528 }
  0x59   :  { %973 = dma.done.wait [#allocation6], 1552  }
  0x5a   :  { %974 = vsyncadd [#allocation6], 4294965744 }
  0x5b   :  { %975 = dma.done.wait [#allocation9], 3088  }
  0x5c   :  { %976 = vsyncadd [#allocation9], 4294964208  ;;  %v988_v0 = vmov 0   ;;  %v86_v1 = vld [vmem:[#allocation2] sm:$0xff]  ;;  %v87_v2 = vld [vmem:[#allocation2 + $0x8] sm:$0xff]  ;;  %vm129_vm1 = vcmask 1046528  }
  0x5d   :  { %252 = vmatprep.subr.bf16.mxu0 %v988_v0  ;;  %v88_v3 = vld [vmem:[#allocation2 + $0x10] sm:$0x3]  ;;  %v1088_v4 = vpack.c.bf16 %v87_v2, %v86_v1  ;;  %vm96_vm0 = vsmask.f32 7424  ;;  %v89_v6 = vld [vmem:[#allocation2 + $0x18] sm:$0xff]  ;;  %v90_v7 = vld [vmem:[#allocation2 + $0x20] sm:$0xff] }
  0x5e   :  { %v93_v5 = vpack.c.bf16 %v88_v3, %v88_v3  ;;  %v91_v8 = vld [vmem:[#allocation2 + $0x28] sm:$0x3]  ;;  %v1090_v9 = vpack.c.bf16 %v90_v7, %v89_v6  ;;  %v803_v11 = vld [vmem:[#allocation5] sm:$0xff]   ;;  %v804_v18 = vld [vmem:[#allocation5 + $0x8] sm:$0xff]   ;;  %vm136_vm2 = vcmask 523264   ;;  %vm325_vm3 = vcmask 1040384  }
  0x5f   :  { %v1092_v10 = vpack.c.bf16 %v91_v8, %v91_v8  ;;  %v98_v12 = vshrl.u32 %v1088_v4, 16  ;;  %v100_v13 = vshll.u32 %v1088_v4, 16  ;;  %253 = vmatpush1.bf16.msra.mxu0 %v803_v11  ;;  %v130_v24 = vrot.slane %v1088_v4, 1  ;;  %v805_v26 = vld [vmem:[#allocation5 + $0x10] sm:$0xff]   ;;  %v806_v31 = vld [vmem:[#allocation5 + $0x18] sm:$0xff]   ;;  %v807_v32 = vld [vmem:[#allocation5 + $0x20] sm:$0xff]  }
  0x60   :  { %v105_v14 = vshll.u32 %v93_v5, 16  ;;  %v110_v15 = vshrl.u32 %v1090_v9, 16  ;;  %v112_v16 = vshll.u32 %v1090_v9, 16  ;;  %254 = vmatprep.subr.bf16.mxu0 %v988_v0  ;;  %v131_v27 = vrot.slane %v93_v5, 1  ;;  %v815_v33 = vld [vmem:[#allocation8 + $0x40] sm:$0xff]   ;;  %v817_v35 = vld [vmem:[#allocation8 + $0x48] sm:$0xff]  }
  0x61   :  { %v117_v17 = vshll.u32 %v1092_v10, 16  ;;  %v102_v19 = vrot.slane %v100_v13, 1  ;;  %v816_v34 = vld [vmem:[#allocation8] sm:$0xff]   ;;  %734 = vmatprep.subr.bf16.mxu1 %v815_v33  ;;  %v818_v36 = vld [vmem:[#allocation8 + $0x8] sm:$0xff]   ;;  %v819_v38 = vld [vmem:[#allocation8 + $0x50] sm:$0xff]   ;;  %v133_v45 = vrot.slane %v1090_v9, 1 }
  0x62   :  { %v107_v20 = vrot.slane %v105_v14, 1  ;;  %v114_v21 = vrot.slane %v112_v16, 1  ;;  %v132_v29 = vsel %vm129_vm1, %v130_v24, %v131_v27  ;;  %735 = vmatpush3.bf16.msra.mxu1 %v816_v34  ;;  %v808_v37 = vld [vmem:[#allocation5 + $0x28] sm:$0xff]   ;;  %v809_v39 = vld [vmem:[#allocation5 + $0x30] sm:$0xff]   ;;  %v810_v40 = vld [vmem:[#allocation5 + $0x38] sm:$0xff]   ;;  %v134_v46 = vrot.slane %v1092_v10, 1 }
  0x63   :  { %v103_v22 = vor.u32 %v102_v19, %v98_v12  ;;  %v119_v23 = vrot.slane %v117_v17, 1  ;;  %255 = vmatpush1.bf16.msra.mxu0 %v804_v18  ;;  %707 = vmatprep.mubr.msk.bf16.mxu0 %vm136_vm2, %v132_v29  ;;  %v811_v41 = vld [vmem:[#allocation5 + $0x40] sm:$0xff]   ;;  %v812_v42 = vld [vmem:[#allocation5 + $0x48] sm:$0xff]   ;;  %v813_v43 = vld [vmem:[#allocation5 + $0x50] sm:$0xff]   ;;  %vm326_vm4 = vsmask.f32 256 }
  0x64   :  { %v115_v25 = vor.u32 %v114_v21, %v110_v15  ;;  %256 = vmatprep.subr.bf16.mxu0 %v988_v0  ;;  %736 = vmatprep.subr.bf16.mxu1 %v817_v35  ;;  %v814_v44 = vld [vmem:[#allocation5 + $0x58] sm:$0xff]   ;;  %v135_v48 = vsel %vm129_vm1, %v133_v45, %v134_v46  ;;  %v823_v55 = vld [vmem:[#allocation8 + $0x60] sm:$0xff]   ;;  %v825_v57 = vld [vmem:[#allocation8 + $0x68] sm:$0xff]   ;;  %s989_s4 = smov [#allocation11]  }
  0x65   :  { %v108_v28 = vsel %vm96_vm0, %v103_v22, %v107_v20  ;;  %v820_v52 = vld [vmem:[#allocation8 + $0x10] sm:$0xff]   ;;  %v821_v53 = vld [vmem:[#allocation8 + $0x58] sm:$0xff]   ;;  %v824_v56 = vld [vmem:[#allocation8 + $0x20] sm:$0xff]  }
  0x66   :  { %121 = vrot.lane.b32.xlu0 %v108_v28, %s980_s28  ;;  %v120_v30 = vsel %vm96_vm0, %v115_v25, %v119_v23  ;;  %737 = vmatpush3.bf16.msra.mxu1 %v818_v36  ;;  %v822_v54 = vld [vmem:[#allocation8 + $0x18] sm:$0xff]   ;;  %v826_v58 = vld [vmem:[#allocation8 + $0x28] sm:$0xff]   ;;  %v827_v59 = vld [vmem:[#allocation8 + $0x70] sm:$0xff]  }
  0x67   :  { %257 = vmatpush1.bf16.msra.mxu0 %v805_v26  ;;  %738 = vmatprep.subr.bf16.mxu1 %v819_v38  ;;  %v828_v60 = vld [vmem:[#allocation8 + $0x30] sm:$0xff]   ;;  %v829_v61 = vld [vmem:[#allocation8 + $0x78] sm:$0xff]   ;;  %v831_v63 = vld [vmem:[#allocation8 + $0x80] sm:$0xff]  }
  0x68   :  { %258 = vmatprep.subr.bf16.mxu0 %v988_v0  ;;  %v830_v62 = vld [vmem:[#allocation8 + $0x38] sm:$0xff]   ;;  %vm1125_vm5 = vmand %vm325_vm3, %vm326_vm4  ;;  %v832_v38 = vld [vmem:[#allocation8 + $0x88] sm:$0xff]  }
  0x69   :  { %v833_v45 = vld [vmem:[#allocation8 + $0x90] sm:$0xff]  }
  0x6a   :  { %123 = vrot.lane.b32.xlu0 %v120_v30, %s980_s28  ;;  %739 = vmatpush3.bf16.msra.mxu1 %v820_v52  ;;  %v835_v52 = vld [vmem:[#allocation8 + $0xa0] sm:$0xff]   ;;  %s680_s28 = sshll.u32 %s989_s4, 4  ;;  %s681_s28 = int_to_ptr.vmem [resolvable:$true] %s680_s28 }
  0x6b   :  { %259 = vmatpush1.bf16.msra.mxu0 %v806_v31  ;;  %740 = vmatprep.subr.bf16.mxu1 %v821_v53  ;;  %v836_v53 = vld [vmem:[#allocation8 + $0xa8] sm:$0xff]   ;;  %s949_s7 = scalar_lea.vmem %s681_s28, 512  ;;  %p954_p13 = scmp.lt.s32.totalorder %s681_s28, %s681_s28 }
  0x6c   :  { %260 = vmatprep.subr.bf16.mxu0 %v988_v0  ;;  %p950_p12 = scmp.ne.s32.totalorder %s681_s28, %s949_s7  ;;  %p955_p0 = scmp.lt.s32.totalorder %s949_s7, %s949_s7 }
  0x6e   :  { %741 = vmatpush3.bf16.msra.mxu1 %v822_v54  ;;  %v837_v54 = vld [vmem:[#allocation8 + $0xb0] sm:$0xff]   ;;  %p956_p1 = por %p955_p0, %p954_p13 }
  0x6f   :  { %261 = vmatpush1.bf16.msra.mxu0 %v807_v32  ;;  %742 = vmatprep.subr.bf16.mxu1 %v823_v55  ;;  %v838_v55 = vld [vmem:[#allocation8 + $0xb8] sm:$0xff]  }
  0x70   :  { %262 = vmatprep.subr.bf16.mxu0 %v988_v0  ;;  %p957_p2 = pnand %p956_p1, %p950_p12 }
  0x72   :  { %743 = vmatpush3.bf16.msra.mxu1 %v824_v56 }
  0x73   :  { %263 = vmatpush1.bf16.msra.mxu0 %v808_v37  ;;  %744 = vmatprep.subr.bf16.mxu1 %v825_v57 }
  0x74   :  { %264 = vmatprep.subr.bf16.mxu0 %v988_v0 }
  0x76   :  { %745 = vmatpush3.bf16.msra.mxu1 %v826_v58 }
  0x77   :  { %265 = vmatpush1.bf16.msra.mxu0 %v809_v39  ;;  %746 = vmatprep.subr.bf16.mxu1 %v827_v59 }
  0x78   :  { %266 = vmatprep.subr.bf16.mxu0 %v988_v0 }
  0x7a   :  { %747 = vmatpush3.bf16.msra.mxu1 %v828_v60 }
  0x7b   :  { %267 = vmatpush1.bf16.msra.mxu0 %v810_v40  ;;  %748 = vmatprep.subr.bf16.mxu1 %v829_v61 }
  0x7c   :  { %268 = vmatprep.subr.bf16.mxu0 %v988_v0 }
  0x7e   :  { %749 = vmatpush3.bf16.msra.mxu1 %v830_v62 }
  0x7f   :  { %269 = vmatpush1.bf16.msra.mxu0 %v811_v41  ;;  %772 = vmatprep.subr.bf16.mxu1 %v831_v63 }
  0x80   :  { %270 = vmatprep.subr.bf16.mxu0 %v988_v0 }
  0x83   :  { %271 = vmatpush1.bf16.msra.mxu0 %v812_v42 }
  0x84   :  { %272 = vmatprep.subr.bf16.mxu0 %v988_v0 }
  0x87   :  { %273 = vmatpush1.bf16.msra.mxu0 %v813_v43 }
  0x88   :  { %274 = vmatprep.subr.bf16.mxu0 %v988_v0  ;;  %v694_v0 = vld [vmem:[#allocation7] ss:$0 sm:$0xff] }
  0x8b   :  { %275 = vmatpush1.bf16.msra.mxu0 %v814_v44 }
  0xd8   :  { %v122_v47 = vpop.permute.xlu0 %121 }
  0xd9   :  { %v138_v49 = vsel %vm136_vm2, %v1088_v4, %v122_v47 }
  0xda   :  { %285 = vmatmul.mubr.bf16.vlgmr.msra.gmra.mrb[0].mxu0 %v138_v49 }
  0xdb   :  { %708 = vmatprep.mubr.msk.bf16.mxu0 %vm136_vm2, %v135_v48 }
  0xdc   :  { %v124_v50 = vpop.permute.xlu0 %123 }
  0xdd   :  { %v141_v51 = vsel %vm136_vm2, %v1090_v9, %v124_v50  ;;  %v834_v50 = vld [vmem:[#allocation8 + $0x98] sm:$0xff]  }
  0xe2   :  { %293 = vmatmul.mubr.bf16.gmra.mrb[4].mxu0 %v141_v51 }
 0x1ad   :  { %v286_v1 = vpop.f32.mrb[0].mxu0 }
 0x1ae   :  { %v287_v2 = vadd.f32 %v694_v0, %v286_v1  ;;  %v288_v3 = vpop.f32.mrb[1].mxu0 }
 0x1af   :  { %v289_v4 = vpop.f32.mrb[2].mxu0 }
 0x1b0   :  { %v290_v5 = vadd.f32 %v694_v0, %v289_v4  ;;  %v291_v6 = vpop.f32.mrb[3].mxu0  ;;  %v301_v7 = vmax.f32 %v287_v2, 0.0 }
 0x1b2   :  { %v302_v8 = vmax.f32 %v290_v5, 0.0 }
 0x1b4   :  { %v305_v9 = vpack.c.bf16 %v302_v8, %v301_v7  ;;  %v709_v7 = vld [vmem:[#allocation10] ss:$0 sm:$0xff] }
 0x1b5   :  { %v294_v10 = vpop.f32.mrb[4].mxu0 }
 0x1b6   :  { %v308_v11 = vshrl.u32 %v305_v9, 16  ;;  %v295_v12 = vadd.f32 %v694_v0, %v294_v10  ;;  %v296_v13 = vpop.f32.mrb[5].mxu0  ;;  %v311_v17 = vshll.u32 %v305_v9, 16 }
 0x1b7   :  { %v297_v15 = vpop.f32.mrb[6].mxu0 }
 0x1b8   :  { %v310_v16 = vrot.slane %v308_v11, 7  ;;  %v303_v18 = vmax.f32 %v295_v12, 0.0  ;;  %v298_v19 = vadd.f32 %v694_v0, %v297_v15  ;;  %v299_v20 = vpop.f32.mrb[7].mxu0 }
 0x1ba   :  { %v313_v21 = vor.u32 %v311_v17, %v310_v16  ;;  %v304_v22 = vmax.f32 %v298_v19, 0.0  ;;  %v330_v23 = vsel %vm1125_vm5, %v310_v16, 0 }
 0x1bb   :  { %v340_v27 = vshll.u32 %v330_v23, 16  ;;  %v363_v49 = vrot.slane %v330_v23, 1 }
 0x1bc   :  { %v328_v24 = vsel %vm1125_vm5, 0, %v313_v21  ;;  %v306_v25 = vpack.c.bf16 %v304_v22, %v303_v18 }
 0x1bd   :  { %v335_v26 = vshll.u32 %v328_v24, 16  ;;  %v333_v30 = vshrl.u32 %v328_v24, 16  ;;  %v342_v34 = vrot.slane %v340_v27, 1  ;;  %v362_v47 = vrot.slane %v328_v24, 1 }
 0x1be   :  { %v315_v28 = vshrl.u32 %v306_v25, 16  ;;  %v318_v29 = vshll.u32 %v306_v25, 16 }
 0x1bf   :  { %v337_v31 = vrot.slane %v335_v26, 1  ;;  %v364_v51 = vsel %vm129_vm1, %v362_v47, %v363_v49 }
 0x1c0   :  { %v317_v32 = vrot.slane %v315_v28, 7 }
 0x1c1   :  { %v338_v33 = vor.u32 %v337_v31, %v333_v30 }
 0x1c2   :  { %v320_v35 = vor.u32 %v318_v29, %v317_v32  ;;  %v331_v36 = vsel %vm1125_vm5, %v317_v32, 0 }
 0x1c3   :  { %v343_v37 = vsel %vm96_vm0, %v338_v33, %v342_v34  ;;  %v352_v39 = vshll.u32 %v331_v36, 16  ;;  %v366_v56 = vrot.slane %v331_v36, 1 }
 0x1c4   :  { %v329_v40 = vsel %vm1125_vm5, 0, %v320_v35  ;;  %601 = vmatprep.mubr.bf16.mxu1 %v343_v37 }
 0x1c5   :  { %602 = vmatmul.mubr.bf16.vlgmr.msra.gmra.mrb[0].mxu1 %v328_v24  ;;  %v345_v41 = vshrl.u32 %v329_v40, 16  ;;  %v347_v42 = vshll.u32 %v329_v40, 16  ;;  %v354_v44 = vrot.slane %v352_v39, 1  ;;  %v365_v57 = vrot.slane %v329_v40, 1 }
 0x1c6   :  { %773 = vmatpush3.bf16.msra.mxu1 %v831_v63 }
 0x1c7   :  { %774 = vmatprep.subr.bf16.mxu1 %v832_v38  ;;  %v349_v43 = vrot.slane %v347_v42, 1  ;;  %v367_v58 = vsel %vm129_vm1, %v365_v57, %v366_v56 }
 0x1c9   :  { %v350_v46 = vor.u32 %v349_v43, %v345_v41 }
 0x1ca   :  { %775 = vmatpush3.bf16.msra.mxu1 %v832_v38 }
 0x1cb   :  { %v355_v48 = vsel %vm96_vm0, %v350_v46, %v354_v44  ;;  %776 = vmatprep.subr.bf16.mxu1 %v833_v45 }
 0x1cc   :  { %609 = vmatprep.mubr.bf16.mxu1 %v355_v48 }
 0x1cd   :  { %610 = vmatmul.mubr.bf16.gmra.mrb[4].mxu1 %v329_v40 }
 0x1ce   :  { %777 = vmatpush3.bf16.msra.mxu1 %v833_v45  ;;  %788 = vmatprep.mubr.bf16.mxu1 %v364_v51 }
 0x1cf   :  { %778 = vmatprep.subr.bf16.mxu1 %v834_v50 }
 0x1d2   :  { %779 = vmatpush3.bf16.msra.mxu1 %v834_v50 }
 0x1d3   :  { %780 = vmatprep.subr.bf16.mxu1 %v835_v52 }
 0x1d6   :  { %781 = vmatpush3.bf16.msra.mxu1 %v835_v52 }
 0x1d7   :  { %782 = vmatprep.subr.bf16.mxu1 %v836_v53 }
 0x1da   :  { %783 = vmatpush3.bf16.msra.mxu1 %v836_v53 }
 0x1db   :  { %784 = vmatprep.subr.bf16.mxu1 %v837_v54 }
 0x1de   :  { %785 = vmatpush3.bf16.msra.mxu1 %v837_v54 }
 0x1df   :  { %786 = vmatprep.subr.bf16.mxu1 %v838_v55 }
 0x1e2   :  { %787 = vmatpush3.bf16.msra.mxu1 %v838_v55 }
 0x1e5   :  { %789 = vmatmul.mubr.bf16.vlgmr.msra.gmra.mrb[8].mxu1 %v367_v58 }
 0x298   :  { %v750_v59 = vpop.f32.mrb[0].mxu1 }
 0x299   :  { %v751_v60 = vpop.f32.mrb[1].mxu1 }
 0x29a   :  { %v752_v61 = vadd.f32 %v751_v60, %v750_v59  ;;  %v753_v62 = vpop.f32.mrb[2].mxu1 }
 0x29b   :  { %v754_v63 = vpop.f32.mrb[3].mxu1 }
 0x29c   :  { %v755_v0 = vadd.f32 %v754_v63, %v753_v62  ;;  %v604_v10 = vadd.f32 %v752_v61, %v709_v7 }
 0x29e   :  { %v607_v16 = vadd.f32 %v755_v0, %v709_v7 }
 0x2a0   :  { %v756_v1 = vpop.f32.mrb[4].mxu1 }
 0x2a1   :  { %v757_v2 = vpop.f32.mrb[5].mxu1 }
 0x2a2   :  { %v758_v3 = vadd.f32 %v757_v2, %v756_v1  ;;  %v759_v4 = vpop.f32.mrb[6].mxu1 }
 0x2a3   :  { %v760_v5 = vpop.f32.mrb[7].mxu1 }
 0x2a4   :  { %v761_v6 = vadd.f32 %v760_v5, %v759_v4  ;;  %v612_v8 = vadd.f32 %v758_v3, %v709_v7 }
 0x2a6   :  { %v615_v13 = vadd.f32 %v761_v6, %v709_v7 }
 0x2b8   :  { %v790_v9 = vpop.f32.mrb[8].mxu1 }
 0x2b9   :  { %v661_v11 = vadd.f32 %v790_v9, %v612_v8  ;;  %v652_v12 = vpop.f32.mrb[9].mxu1 }
 0x2ba   :  { %v653_v14 = vadd.f32 %v652_v12, %v604_v10  ;;  %v791_v15 = vpop.f32.mrb[10].mxu1 }
 0x2bb   :  { %v669_v17 = vmax.f32 %v661_v11, 0.0  ;;  %v664_v18 = vadd.f32 %v791_v15, %v615_v13  ;;  %v655_v19 = vpop.f32.mrb[11].mxu1 }
 0x2bc   :  { %v667_v20 = vmax.f32 %v653_v14, 0.0  ;;  %v656_v21 = vadd.f32 %v655_v19, %v607_v16 }
 0x2bd   :  { %673 = vst [vmem:[#allocation11 + $0x10] sm:$0xff] %v669_v17  ;;  %v670_v22 = vmax.f32 %v664_v18, 0.0 }
 0x2be   :  { %671 = vst [vmem:[#allocation11] sm:$0xff] %v667_v20  ;;  %v668_v23 = vmax.f32 %v656_v21, 0.0 }
 0x2bf   :  { %674 = vst [vmem:[#allocation11 + $0x18] sm:$0xff] %v670_v22 }
 0x2c0   :  { %672 = vst [vmem:[#allocation11 + $0x8] sm:$0xff] %v668_v23 }
 0x2c1   :  { %960 = shalt.err (!%p957_p2)
}
 0x2c2   :  { %s961_s11 = scalar_lea.hbm %s1161_s5, 512 }
 0x2c3   :  { %p962_p3 = scmp.ne.s32.totalorder %s1161_s5, %s961_s11  ;;  %p965_p4 = scmp.lt.u32.totalorder %s961_s11, %s1161_s5 }
 0x2c5   :  { %p967_p5 = pnand %p965_p4, %p962_p3 }
 0x2c7   :  { %970 = shalt.err (!%p967_p5)
}
 0x2c8   :  { %686 = dma.vmem_to_hbm [thread:$0]  %s681_s28, 512, %s1161_s5, [#allocation4], %s984_s3, %s984_s3, %s985_s29  }
 0x2c9   :  { %977 = dma.done.wait [#allocation4], 512  }
 0x2ca   :  { %978 = vsyncadd [#allocation4], 4294966784 }
 0x2cb   :  { %690 = vsyncpa [#allocation3], 1 }
 0x2cc   :  { %691 = vsyncpa [#allocation6], 1 }
 0x2cd   :  { %692 = vsyncpa [#allocation9], 1 }
 0x2ce   :  { %693 = vsyncpa [#allocation4], 1 }

// kernel: tpu_custom_call.1
= control target key start
LH: loop header
LB: loop body
LE: loop exit
PB: predicated region body
PF: predicated region fallthrough
CT: control target
= control target key end

     0   :  { %10 = vsyncpa [#allocation3], 0  ;;  %s1156_s0 = inlined_call_operand.hbm [shape: f32[2,18,64], index: 0, kind: input, shape index: {}]   ;;  %s1157_s1 = inlined_call_operand.hbm [shape: bf16[192,128], index: 1, kind: input, shape index: {}]   ;;  %s1158_s2 = inlined_call_operand.hbm [shape: f32[1,128], index: 2, kind: input, shape index: {}]   ;;  %s1159_s3 = inlined_call_operand.hbm [shape: bf16[384,128], index: 3, kind: input, shape index: {}]   ;;  %s1160_s4 = inlined_call_operand.hbm [shape: f32[1,128], index: 4, kind: input, shape index: {}]   ;;  %s1161_s5 = inlined_call_operand.hbm [shape: f32[2,16,128], index: 5, kind: output, shape index: {}]  }
   0x1   :  { %11 = vsyncpa [#allocation6], 0 }
   0x2   :  { %12 = vsyncpa [#allocation9], 0 }
   0x3   :  { %13 = vsyncpa [#allocation4], 0  ;;  %s979_s18 = smov [#allocation5]   ;;  %s839_s22 = scalar_lea.hbm %s1157_s1, 1536 }
   0x4   :  { %s31_s19 = sshll.u32 %s979_s18, 4  ;;  %p840_p0 = scmp.ne.s32.totalorder %s1157_s1, %s839_s22  ;;  %s32_s19 = int_to_ptr.vmem [resolvable:$true] %s31_s19 }
   0x5   :  { %p843_p1 = scmp.lt.u32.totalorder %s839_s22, %s1157_s1 }
   0x7   :  { %p845_p2 = pnand %p843_p1, %p840_p0 }
   0x9   :  { %848 = shalt.err (!%p845_p2)
}
   0xa   :  { %s849_s27 = scalar_lea.vmem %s32_s19, 1536  ;;  %p854_p4 = scmp.lt.s32.totalorder %s32_s19, %s32_s19 }
   0xb   :  { %p850_p3 = scmp.ne.s32.totalorder %s32_s19, %s849_s27  ;;  %p855_p5 = scmp.lt.s32.totalorder %s849_s27, %s849_s27 }
   0xd   :  { %p856_p6 = por %p855_p5, %p854_p4 }
   0xf   :  { %p857_p7 = pnand %p856_p6, %p850_p3 }
  0x11   :  { %860 = shalt.err (!%p857_p7)
}
  0x12   :  { %s980_s28 = smov 64   ;;  %s981_s29 = smov 4  }
  0x13   :  { %37 = dma.hbm_to_vmem [thread:$0]  %s1157_s1, 1536, %s32_s19, [#allocation6], %s980_s28, %s980_s28, %s981_s29  }
  0x14   :  { %s982_s7 = smov [#allocation8]   ;;  %s983_s9 = smov [#allocation2]  }
  0x15   :  { %s53_s8 = sshll.u32 %s982_s7, 4  ;;  %s19_s10 = sshll.u32 %s983_s9, 4  ;;  %s54_s8 = int_to_ptr.vmem [resolvable:$true] %s53_s8  ;;  %s20_s10 = int_to_ptr.vmem [resolvable:$true] %s19_s10 }
  0x16   :  { %s861_s13 = scalar_lea.hbm %s1159_s3, 3072 }
  0x17   :  { %p862_p8 = scmp.ne.s32.totalorder %s1159_s3, %s861_s13  ;;  %p865_p9 = scmp.lt.u32.totalorder %s861_s13, %s1159_s3 }
  0x19   :  { %p867_p10 = pnand %p865_p9, %p862_p8 }
  0x1b   :  { %870 = shalt.err (!%p867_p10)
}
  0x1c   :  { %s871_s1 = scalar_lea.vmem %s54_s8, 3072  ;;  %p876_p12 = scmp.lt.s32.totalorder %s54_s8, %s54_s8 }
  0x1d   :  { %p872_p11 = scmp.ne.s32.totalorder %s54_s8, %s871_s1  ;;  %p877_p13 = scmp.lt.s32.totalorder %s871_s1, %s871_s1 }
  0x1f   :  { %p878_p0 = por %p877_p13, %p876_p12 }
  0x21   :  { %p879_p1 = pnand %p878_p0, %p872_p11 }
  0x23   :  { %882 = shalt.err (!%p879_p1)
}
  0x24   :  { %59 = dma.hbm_to_vmem [thread:$0]  %s1159_s3, 3072, %s54_s8, [#allocation9], %s980_s28, %s980_s28, %s981_s29  }
  0x25   :  { %s883_s22 = scalar_lea.hbm %s1156_s0, 768 }
  0x26   :  { %p884_p2 = scmp.ne.s32.totalorder %s1156_s0, %s883_s22  ;;  %p887_p3 = scmp.lt.u32.totalorder %s883_s22, %s1156_s0 }
  0x28   :  { %p889_p4 = pnand %p887_p3, %p884_p2 }
  0x2a   :  { %892 = shalt.err (!%p889_p4)
}
  0x2b   :  { %s893_s27 = scalar_lea.vmem %s20_s10, 768  ;;  %p898_p6 = scmp.lt.s32.totalorder %s20_s10, %s20_s10 }
  0x2c   :  { %p894_p5 = scmp.ne.s32.totalorder %s20_s10, %s893_s27  ;;  %p899_p7 = scmp.lt.s32.totalorder %s893_s27, %s893_s27 }
  0x2e   :  { %p900_p8 = por %p899_p7, %p898_p6 }
  0x30   :  { %p901_p9 = pnand %p900_p8, %p894_p5 }
  0x32   :  { %904 = shalt.err (!%p901_p9)
}
  0x33   :  { %s984_s3 = smov 128   ;;  %s985_s29 = smov 8  }
  0x34   :  { %25 = dma.hbm_to_vmem [thread:$0]  %s1156_s0, 768, %s20_s10, [#allocation3], %s984_s3, %s984_s3, %s985_s29  }
  0x35   :  { %s986_s7 = smov [#allocation7]   ;;  %s987_s9 = smov [#allocation10]  }
  0x36   :  { %s44_s8 = sshll.u32 %s986_s7, 4  ;;  %s66_s11 = sshll.u32 %s987_s9, 4  ;;  %s45_s8 = int_to_ptr.vmem [resolvable:$true] %s44_s8  ;;  %s67_s11 = int_to_ptr.vmem [resolvable:$true] %s66_s11 }
  0x37   :  { %s905_s14 = scalar_lea.hbm %s1158_s2, 16 }
  0x38   :  { %p906_p10 = scmp.ne.s32.totalorder %s1158_s2, %s905_s14  ;;  %p909_p11 = scmp.lt.u32.totalorder %s905_s14, %s1158_s2 }
  0x3a   :  { %p911_p12 = pnand %p909_p11, %p906_p10 }
  0x3c   :  { %914 = shalt.err (!%p911_p12)
}
  0x3d   :  { %s915_s0 = scalar_lea.vmem %s45_s8, 16  ;;  %s919_s10 = scalar_lea.vmem %s45_s8, 32 }
  0x3e   :  { %p916_p13 = scmp.ne.s32.totalorder %s45_s8, %s915_s0  ;;  %p920_p0 = scmp.lt.s32.totalorder %s45_s8, %s45_s8 }
  0x3f   :  { %p921_p1 = scmp.lt.s32.totalorder %s919_s10, %s915_s0 }
  0x41   :  { %p922_p2 = por %p921_p1, %p920_p0 }
  0x43   :  { %p923_p3 = pnand %p922_p2, %p916_p13 }
  0x45   :  { %926 = shalt.err (!%p923_p3)
}
  0x46   :  { %47 = dma.hbm_to_vmem [thread:$0]  %s1158_s2, 16, %s45_s8, [#allocation6]  }
  0x47   :  { %s927_s22 = scalar_lea.hbm %s1160_s4, 16 }
  0x48   :  { %p928_p4 = scmp.ne.s32.totalorder %s1160_s4, %s927_s22  ;;  %p931_p5 = scmp.lt.u32.totalorder %s927_s22, %s1160_s4 }
  0x4a   :  { %p933_p6 = pnand %p931_p5, %p928_p4 }
  0x4c   :  { %936 = shalt.err (!%p933_p6)
}
  0x4d   :  { %s937_s27 = scalar_lea.vmem %s67_s11, 16  ;;  %s941_s30 = scalar_lea.vmem %s67_s11, 32 }
  0x4e   :  { %p938_p7 = scmp.ne.s32.totalorder %s67_s11, %s937_s27  ;;  %p942_p8 = scmp.lt.s32.totalorder %s67_s11, %s67_s11 }
  0x4f   :  { %p943_p9 = scmp.lt.s32.totalorder %s941_s30, %s937_s27 }
  0x51   :  { %p944_p10 = por %p943_p9, %p942_p8 }
  0x53   :  { %p945_p11 = pnand %p944_p10, %p938_p7 }
  0x55   :  { %948 = shalt.err (!%p945_p11)
}
  0x56   :  { %69 = dma.hbm_to_vmem [thread:$0]  %s1160_s4, 16, %s67_s11, [#allocation9]  }
  0x57   :  { %971 = dma.done.wait [#allocation3], 768  }
  0x58   :  { %972 = vsyncadd [#allocation3], 4294966528 }
  0x59   :  { %973 = dma.done.wait [#allocation6], 1552  }
  0x5a   :  { %974 = vsyncadd [#allocation6], 4294965744 }
  0x5b   :  { %975 = dma.done.wait [#allocation9], 3088  }
  0x5c   :  { %976 = vsyncadd [#allocation9], 4294964208  ;;  %v988_v0 = vmov 0   ;;  %v86_v1 = vld [vmem:[#allocation2] sm:$0xff]  ;;  %v87_v2 = vld [vmem:[#allocation2 + $0x8] sm:$0xff]  ;;  %vm129_vm1 = vcmask 1046528  }
  0x5d   :  { %252 = vmatprep.subr.bf16.mxu0 %v988_v0  ;;  %v88_v3 = vld [vmem:[#allocation2 + $0x10] sm:$0x3]  ;;  %v1088_v4 = vpack.c.bf16 %v87_v2, %v86_v1  ;;  %vm96_vm0 = vsmask.f32 7424  ;;  %v89_v6 = vld [vmem:[#allocation2 + $0x18] sm:$0xff]  ;;  %v90_v7 = vld [vmem:[#allocation2 + $0x20] sm:$0xff] }
  0x5e   :  { %v93_v5 = vpack.c.bf16 %v88_v3, %v88_v3  ;;  %v91_v8 = vld [vmem:[#allocation2 + $0x28] sm:$0x3]  ;;  %v1090_v9 = vpack.c.bf16 %v90_v7, %v89_v6  ;;  %v803_v11 = vld [vmem:[#allocation5] sm:$0xff]   ;;  %v804_v18 = vld [vmem:[#allocation5 + $0x8] sm:$0xff]   ;;  %vm136_vm2 = vcmask 523264   ;;  %vm325_vm3 = vcmask 1040384  }
  0x5f   :  { %v1092_v10 = vpack.c.bf16 %v91_v8, %v91_v8  ;;  %v98_v12 = vshrl.u32 %v1088_v4, 16  ;;  %v100_v13 = vshll.u32 %v1088_v4, 16  ;;  %253 = vmatpush1.bf16.msra.mxu0 %v803_v11  ;;  %v130_v24 = vrot.slane %v1088_v4, 1  ;;  %v805_v26 = vld [vmem:[#allocation5 + $0x10] sm:$0xff]   ;;  %v806_v31 = vld [vmem:[#allocation5 + $0x18] sm:$0xff]   ;;  %v807_v32 = vld [vmem:[#allocation5 + $0x20] sm:$0xff]  }
  0x60   :  { %v105_v14 = vshll.u32 %v93_v5, 16  ;;  %v110_v15 = vshrl.u32 %v1090_v9, 16  ;;  %v112_v16 = vshll.u32 %v1090_v9, 16  ;;  %254 = vmatprep.subr.bf16.mxu0 %v988_v0  ;;  %v131_v27 = vrot.slane %v93_v5, 1  ;;  %v815_v33 = vld [vmem:[#allocation8 + $0x40] sm:$0xff]   ;;  %v817_v35 = vld [vmem:[#allocation8 + $0x48] sm:$0xff]  }
  0x61   :  { %v117_v17 = vshll.u32 %v1092_v10, 16  ;;  %v102_v19 = vrot.slane %v100_v13, 1  ;;  %v816_v34 = vld [vmem:[#allocation8] sm:$0xff]   ;;  %734 = vmatprep.subr.bf16.mxu1 %v815_v33  ;;  %v818_v36 = vld [vmem:[#allocation8 + $0x8] sm:$0xff]   ;;  %v819_v38 = vld [vmem:[#allocation8 + $0x50] sm:$0xff]   ;;  %v133_v45 = vrot.slane %v1090_v9, 1 }
  0x62   :  { %v107_v20 = vrot.slane %v105_v14, 1  ;;  %v114_v21 = vrot.slane %v112_v16, 1  ;;  %v132_v29 = vsel %vm129_vm1, %v130_v24, %v131_v27  ;;  %735 = vmatpush3.bf16.msra.mxu1 %v816_v34  ;;  %v808_v37 = vld [vmem:[#allocation5 + $0x28] sm:$0xff]   ;;  %v809_v39 = vld [vmem:[#allocation5 + $0x30] sm:$0xff]   ;;  %v810_v40 = vld [vmem:[#allocation5 + $0x38] sm:$0xff]   ;;  %v134_v46 = vrot.slane %v1092_v10, 1 }
  0x63   :  { %v103_v22 = vor.u32 %v102_v19, %v98_v12  ;;  %v119_v23 = vrot.slane %v117_v17, 1  ;;  %255 = vmatpush1.bf16.msra.mxu0 %v804_v18  ;;  %707 = vmatprep.mubr.msk.bf16.mxu0 %vm136_vm2, %v132_v29  ;;  %v811_v41 = vld [vmem:[#allocation5 + $0x40] sm:$0xff]   ;;  %v812_v42 = vld [vmem:[#allocation5 + $0x48] sm:$0xff]   ;;  %v813_v43 = vld [vmem:[#allocation5 + $0x50] sm:$0xff]   ;;  %vm326_vm4 = vsmask.f32 256 }
  0x64   :  { %v115_v25 = vor.u32 %v114_v21, %v110_v15  ;;  %256 = vmatprep.subr.bf16.mxu0 %v988_v0  ;;  %736 = vmatprep.subr.bf16.mxu1 %v817_v35  ;;  %v814_v44 = vld [vmem:[#allocation5 + $0x58] sm:$0xff]   ;;  %v135_v48 = vsel %vm129_vm1, %v133_v45, %v134_v46  ;;  %v823_v55 = vld [vmem:[#allocation8 + $0x60] sm:$0xff]   ;;  %v825_v57 = vld [vmem:[#allocation8 + $0x68] sm:$0xff]   ;;  %s989_s4 = smov [#allocation11]  }
  0x65   :  { %v108_v28 = vsel %vm96_vm0, %v103_v22, %v107_v20  ;;  %v820_v52 = vld [vmem:[#allocation8 + $0x10] sm:$0xff]   ;;  %v821_v53 = vld [vmem:[#allocation8 + $0x58] sm:$0xff]   ;;  %v824_v56 = vld [vmem:[#allocation8 + $0x20] sm:$0xff]  }
  0x66   :  { %121 = vrot.lane.b32.xlu0 %v108_v28, %s980_s28  ;;  %v120_v30 = vsel %vm96_vm0, %v115_v25, %v119_v23  ;;  %737 = vmatpush3.bf16.msra.mxu1 %v818_v36  ;;  %v822_v54 = vld [vmem:[#allocation8 + $0x18] sm:$0xff]   ;;  %v826_v58 = vld [vmem:[#allocation8 + $0x28] sm:$0xff]   ;;  %v827_v59 = vld [vmem:[#allocation8 + $0x70] sm:$0xff]  }
  0x67   :  { %257 = vmatpush1.bf16.msra.mxu0 %v805_v26  ;;  %738 = vmatprep.subr.bf16.mxu1 %v819_v38  ;;  %v828_v60 = vld [vmem:[#allocation8 + $0x30] sm:$0xff]   ;;  %v829_v61 = vld [vmem:[#allocation8 + $0x78] sm:$0xff]   ;;  %v831_v63 = vld [vmem:[#allocation8 + $0x80] sm:$0xff]  }
  0x68   :  { %258 = vmatprep.subr.bf16.mxu0 %v988_v0  ;;  %v830_v62 = vld [vmem:[#allocation8 + $0x38] sm:$0xff]   ;;  %vm1125_vm5 = vmand %vm325_vm3, %vm326_vm4  ;;  %v832_v38 = vld [vmem:[#allocation8 + $0x88] sm:$0xff]  }
  0x69   :  { %v833_v45 = vld [vmem:[#allocation8 + $0x90] sm:$0xff]  }
  0x6a   :  { %123 = vrot.lane.b32.xlu0 %v120_v30, %s980_s28  ;;  %739 = vmatpush3.bf16.msra.mxu1 %v820_v52  ;;  %v835_v52 = vld [vmem:[#allocation8 + $0xa0] sm:$0xff]   ;;  %s680_s28 = sshll.u32 %s989_s4, 4  ;;  %s681_s28 = int_to_ptr.vmem [resolvable:$true] %s680_s28 }
  0x6b   :  { %259 = vmatpush1.bf16.msra.mxu0 %v806_v31  ;;  %740 = vmatprep.subr.bf16.mxu1 %v821_v53  ;;  %v836_v53 = vld [vmem:[#allocation8 + $0xa8] sm:$0xff]   ;;  %s949_s7 = scalar_lea.vmem %s681_s28, 512  ;;  %p954_p13 = scmp.lt.s32.totalorder %s681_s28, %s681_s28 }
  0x6c   :  { %260 = vmatprep.subr.bf16.mxu0 %v988_v0  ;;  %p950_p12 = scmp.ne.s32.totalorder %s681_s28, %s949_s7  ;;  %p955_p0 = scmp.lt.s32.totalorder %s949_s7, %s949_s7 }
  0x6e   :  { %741 = vmatpush3.bf16.msra.mxu1 %v822_v54  ;;  %v837_v54 = vld [vmem:[#allocation8 + $0xb0] sm:$0xff]   ;;  %p956_p1 = por %p955_p0, %p954_p13 }
  0x6f   :  { %261 = vmatpush1.bf16.msra.mxu0 %v807_v32  ;;  %742 = vmatprep.subr.bf16.mxu1 %v823_v55  ;;  %v838_v55 = vld [vmem:[#allocation8 + $0xb8] sm:$0xff]  }
  0x70   :  { %262 = vmatprep.subr.bf16.mxu0 %v988_v0  ;;  %p957_p2 = pnand %p956_p1, %p950_p12 }
  0x72   :  { %743 = vmatpush3.bf16.msra.mxu1 %v824_v56 }
  0x73   :  { %263 = vmatpush1.bf16.msra.mxu0 %v808_v37  ;;  %744 = vmatprep.subr.bf16.mxu1 %v825_v57 }
  0x74   :  { %264 = vmatprep.subr.bf16.mxu0 %v988_v0 }
  0x76   :  { %745 = vmatpush3.bf16.msra.mxu1 %v826_v58 }
  0x77   :  { %265 = vmatpush1.bf16.msra.mxu0 %v809_v39  ;;  %746 = vmatprep.subr.bf16.mxu1 %v827_v59 }
  0x78   :  { %266 = vmatprep.subr.bf16.mxu0 %v988_v0 }
  0x7a   :  { %747 = vmatpush3.bf16.msra.mxu1 %v828_v60 }
  0x7b   :  { %267 = vmatpush1.bf16.msra.mxu0 %v810_v40  ;;  %748 = vmatprep.subr.bf16.mxu1 %v829_v61 }
  0x7c   :  { %268 = vmatprep.subr.bf16.mxu0 %v988_v0 }
  0x7e   :  { %749 = vmatpush3.bf16.msra.mxu1 %v830_v62 }
  0x7f   :  { %269 = vmatpush1.bf16.msra.mxu0 %v811_v41  ;;  %772 = vmatprep.subr.bf16.mxu1 %v831_v63 }
  0x80   :  { %270 = vmatprep.subr.bf16.mxu0 %v988_v0 }
  0x83   :  { %271 = vmatpush1.bf16.msra.mxu0 %v812_v42 }
  0x84   :  { %272 = vmatprep.subr.bf16.mxu0 %v988_v0 }
  0x87   :  { %273 = vmatpush1.bf16.msra.mxu0 %v813_v43 }
  0x88   :  { %274 = vmatprep.subr.bf16.mxu0 %v988_v0  ;;  %v694_v0 = vld [vmem:[#allocation7] ss:$0 sm:$0xff] }
  0x8b   :  { %275 = vmatpush1.bf16.msra.mxu0 %v814_v44 }
  0xd8   :  { %v122_v47 = vpop.permute.xlu0 %121 }
  0xd9   :  { %v138_v49 = vsel %vm136_vm2, %v1088_v4, %v122_v47 }
  0xda   :  { %285 = vmatmul.mubr.bf16.vlgmr.msra.gmra.mrb[0].mxu0 %v138_v49 }
  0xdb   :  { %708 = vmatprep.mubr.msk.bf16.mxu0 %vm136_vm2, %v135_v48 }
  0xdc   :  { %v124_v50 = vpop.permute.xlu0 %123 }
  0xdd   :  { %v141_v51 = vsel %vm136_vm2, %v1090_v9, %v124_v50  ;;  %v834_v50 = vld [vmem:[#allocation8 + $0x98] sm:$0xff]  }
  0xe2   :  { %293 = vmatmul.mubr.bf16.gmra.mrb[4].mxu0 %v141_v51 }
 0x1ad   :  { %v286_v1 = vpop.f32.mrb[0].mxu0 }
 0x1ae   :  { %v287_v2 = vadd.f32 %v694_v0, %v286_v1  ;;  %v288_v3 = vpop.f32.mrb[1].mxu0 }
 0x1af   :  { %v289_v4 = vpop.f32.mrb[2].mxu0 }
 0x1b0   :  { %v290_v5 = vadd.f32 %v694_v0, %v289_v4  ;;  %v291_v6 = vpop.f32.mrb[3].mxu0  ;;  %v301_v7 = vmax.f32 %v287_v2, 0.0 }
 0x1b2   :  { %v302_v8 = vmax.f32 %v290_v5, 0.0 }
 0x1b4   :  { %v305_v9 = vpack.c.bf16 %v302_v8, %v301_v7  ;;  %v709_v7 = vld [vmem:[#allocation10] ss:$0 sm:$0xff] }
 0x1b5   :  { %v294_v10 = vpop.f32.mrb[4].mxu0 }
 0x1b6   :  { %v308_v11 = vshrl.u32 %v305_v9, 16  ;;  %v295_v12 = vadd.f32 %v694_v0, %v294_v10  ;;  %v296_v13 = vpop.f32.mrb[5].mxu0  ;;  %v311_v17 = vshll.u32 %v305_v9, 16 }
 0x1b7   :  { %v297_v15 = vpop.f32.mrb[6].mxu0 }
 0x1b8   :  { %v310_v16 = vrot.slane %v308_v11, 7  ;;  %v303_v18 = vmax.f32 %v295_v12, 0.0  ;;  %v298_v19 = vadd.f32 %v694_v0, %v297_v15  ;;  %v299_v20 = vpop.f32.mrb[7].mxu0 }
 0x1ba   :  { %v313_v21 = vor.u32 %v311_v17, %v310_v16  ;;  %v304_v22 = vmax.f32 %v298_v19, 0.0  ;;  %v330_v23 = vsel %vm1125_vm5, %v310_v16, 0 }
 0x1bb   :  { %v340_v27 = vshll.u32 %v330_v23, 16  ;;  %v363_v49 = vrot.slane %v330_v23, 1 }
 0x1bc   :  { %v328_v24 = vsel %vm1125_vm5, 0, %v313_v21  ;;  %v306_v25 = vpack.c.bf16 %v304_v22, %v303_v18 }
 0x1bd   :  { %v335_v26 = vshll.u32 %v328_v24, 16  ;;  %v333_v30 = vshrl.u32 %v328_v24, 16  ;;  %v342_v34 = vrot.slane %v340_v27, 1  ;;  %v362_v47 = vrot.slane %v328_v24, 1 }
 0x1be   :  { %v315_v28 = vshrl.u32 %v306_v25, 16  ;;  %v318_v29 = vshll.u32 %v306_v25, 16 }
 0x1bf   :  { %v337_v31 = vrot.slane %v335_v26, 1  ;;  %v364_v51 = vsel %vm129_vm1, %v362_v47, %v363_v49 }
 0x1c0   :  { %v317_v32 = vrot.slane %v315_v28, 7 }
 0x1c1   :  { %v338_v33 = vor.u32 %v337_v31, %v333_v30 }
 0x1c2   :  { %v320_v35 = vor.u32 %v318_v29, %v317_v32  ;;  %v331_v36 = vsel %vm1125_vm5, %v317_v32, 0 }
 0x1c3   :  { %v343_v37 = vsel %vm96_vm0, %v338_v33, %v342_v34  ;;  %v352_v39 = vshll.u32 %v331_v36, 16  ;;  %v366_v56 = vrot.slane %v331_v36, 1 }
 0x1c4   :  { %v329_v40 = vsel %vm1125_vm5, 0, %v320_v35  ;;  %601 = vmatprep.mubr.bf16.mxu1 %v343_v37 }
 0x1c5   :  { %602 = vmatmul.mubr.bf16.vlgmr.msra.gmra.mrb[0].mxu1 %v328_v24  ;;  %v345_v41 = vshrl.u32 %v329_v40, 16  ;;  %v347_v42 = vshll.u32 %v329_v40, 16  ;;  %v354_v44 = vrot.slane %v352_v39, 1  ;;  %v365_v57 = vrot.slane %v329_v40, 1 }
 0x1c6   :  { %773 = vmatpush3.bf16.msra.mxu1 %v831_v63 }
 0x1c7   :  { %774 = vmatprep.subr.bf16.mxu1 %v832_v38  ;;  %v349_v43 = vrot.slane %v347_v42, 1  ;;  %v367_v58 = vsel %vm129_vm1, %v365_v57, %v366_v56 }
 0x1c9   :  { %v350_v46 = vor.u32 %v349_v43, %v345_v41 }
 0x1ca   :  { %775 = vmatpush3.bf16.msra.mxu1 %v832_v38 }
 0x1cb   :  { %v355_v48 = vsel %vm96_vm0, %v350_v46, %v354_v44  ;;  %776 = vmatprep.subr.bf16.mxu1 %v833_v45 }
 0x1cc   :  { %609 = vmatprep.mubr.bf16.mxu1 %v355_v48 }
 0x1cd   :  { %610 = vmatmul.mubr.bf16.gmra.mrb[4].mxu1 %v329_v40 }
 0x1ce   :  { %777 = vmatpush3.bf16.msra.mxu1 %v833_v45  ;;  %788 = vmatprep.mubr.bf16.mxu1 %v364_v51 }
 0x1cf   :  { %778 = vmatprep.subr.bf16.mxu1 %v834_v50 }
 0x1d2   :  { %779 = vmatpush3.bf16.msra.mxu1 %v834_v50 }
 0x1d3   :  { %780 = vmatprep.subr.bf16.mxu1 %v835_v52 }
 0x1d6   :  { %781 = vmatpush3.bf16.msra.mxu1 %v835_v52 }
 0x1d7   :  { %782 = vmatprep.subr.bf16.mxu1 %v836_v53 }
 0x1da   :  { %783 = vmatpush3.bf16.msra.mxu1 %v836_v53 }
 0x1db   :  { %784 = vmatprep.subr.bf16.mxu1 %v837_v54 }
 0x1de   :  { %785 = vmatpush3.bf16.msra.mxu1 %v837_v54 }
 0x1df   :  { %786 = vmatprep.subr.bf16.mxu1 %v838_v55 }
 0x1e2   :  { %787 = vmatpush3.bf16.msra.mxu1 %v838_v55 }
 0x1e5   :  { %789 = vmatmul.mubr.bf16.vlgmr.msra.gmra.mrb[8].mxu1 %v367_v58 }
 0x298   :  { %v750_v59 = vpop.f32.mrb[0].mxu1 }
 0x299   :  { %v751_v60 = vpop.f32.mrb[1].mxu1 }
 0x29a   :  { %v752_v61 = vadd.f32 %v751_v60, %v750_v59  ;;  %v753_v62 = vpop.f32.mrb[2].mxu1 }
 0x29b   :  { %v754_v63 = vpop.f32.mrb[3].mxu1 }
 0x29c   :  { %v755_v0 = vadd.f32 %v754_v63, %v753_v62  ;;  %v604_v10 = vadd.f32 %v752_v61, %v709_v7 }
 0x29e   :  { %v607_v16 = vadd.f32 %v755_v0, %v709_v7 }
 0x2a0   :  { %v756_v1 = vpop.f32.mrb[4].mxu1 }
 0x2a1   :  { %v757_v2 = vpop.f32.mrb[5].mxu1 }
 0x2a2   :  { %v758_v3 = vadd.f32 %v757_v2, %v756_v1  ;;  %v759_v4 = vpop.f32.mrb[6].mxu1 }
 0x2a3   :  { %v760_v5 = vpop.f32.mrb[7].mxu1 }
 0x2a4   :  { %v761_v6 = vadd.f32 %v760_v5, %v759_v4  ;;  %v612_v8 = vadd.f32 %v758_v3, %v709_v7 }
 0x2a6   :  { %v615_v13 = vadd.f32 %v761_v6, %v709_v7 }
 0x2b8   :  { %v790_v9 = vpop.f32.mrb[8].mxu1 }
 0x2b9   :  { %v661_v11 = vadd.f32 %v790_v9, %v612_v8  ;;  %v652_v12 = vpop.f32.mrb[9].mxu1 }
 0x2ba   :  { %v653_v14 = vadd.f32 %v652_v12, %v604_v10  ;;  %v791_v15 = vpop.f32.mrb[10].mxu1 }
 0x2bb   :  { %v669_v17 = vmax.f32 %v661_v11, 0.0  ;;  %v664_v18 = vadd.f32 %v791_v15, %v615_v13  ;;  %v655_v19 = vpop.f32.mrb[11].mxu1 }
 0x2bc   :  { %v667_v20 = vmax.f32 %v653_v14, 0.0  ;;  %v656_v21 = vadd.f32 %v655_v19, %v607_v16 }
 0x2bd   :  { %673 = vst [vmem:[#allocation11 + $0x10] sm:$0xff] %v669_v17  ;;  %v670_v22 = vmax.f32 %v664_v18, 0.0 }
 0x2be   :  { %671 = vst [vmem:[#allocation11] sm:$0xff] %v667_v20  ;;  %v668_v23 = vmax.f32 %v656_v21, 0.0 }
 0x2bf   :  { %674 = vst [vmem:[#allocation11 + $0x18] sm:$0xff] %v670_v22 }
 0x2c0   :  { %672 = vst [vmem:[#allocation11 + $0x8] sm:$0xff] %v668_v23 }
 0x2c1   :  { %960 = shalt.err (!%p957_p2)
}
 0x2c2   :  { %s961_s11 = scalar_lea.hbm %s1161_s5, 512 }
 0x2c3   :  { %p962_p3 = scmp.ne.s32.totalorder %s1161_s5, %s961_s11  ;;  %p965_p4 = scmp.lt.u32.totalorder %s961_s11, %s1161_s5 }
 0x2c5   :  { %p967_p5 = pnand %p965_p4, %p962_p3 }
 0x2c7   :  { %970 = shalt.err (!%p967_p5)
}
 0x2c8   :  { %686 = dma.vmem_to_hbm [thread:$0]  %s681_s28, 512, %s1161_s5, [#allocation4], %s984_s3, %s984_s3, %s985_s29  }
 0x2c9   :  { %977 = dma.done.wait [#allocation4], 512  }
 0x2ca   :  { %978 = vsyncadd [#allocation4], 4294966784 }
 0x2cb   :  { %690 = vsyncpa [#allocation3], 1 }
 0x2cc   :  { %691 = vsyncpa [#allocation6], 1 }
 0x2cd   :  { %692 = vsyncpa [#allocation9], 1 }
 0x2ce   :  { %693 = vsyncpa [#allocation4], 1 }

</bundles_post_ra>
